<compile_context>
chip_gen: v7x
topology: tpu7x:2x2x1
jax: 0.10.0
libtpu: 0.0.40
codegen_flags: <defaults>
</compile_context>

<pallas_src>
import jax
import jax.numpy as jnp
from jax.experimental import pallas as pl
from jax.experimental.pallas import tpu as pltpu

EPS = 1e-5
LANE = 128


def _ceil_to(n, m):
    return ((n + m - 1) // m) * m


# ---------------------------------------------------------------------------
# Fused kernel
# ---------------------------------------------------------------------------
def _make_fused_kernel(layer_meta, e_pad, n_valid, batch_pad):
    """layer_meta: per residual layer (in_width_pad, out_offset, out_width_pad)."""
    n_layers = len(layer_meta)
    n_in = 1 + 3 * n_layers + 2  # x, (w, gamma, beta)*L, w_final, b_final
    need_mask = (n_valid != batch_pad)
    inv_n = 1.0 / float(n_valid)

    def kernel(*refs):
        x_ref = refs[0]
        wf_ref = refs[1 + 3 * n_layers]
        bf_ref = refs[2 + 3 * n_layers]
        out_ref = refs[n_in]
        slab = refs[n_in + 1]

        if need_mask:
            row_mask = (
                jax.lax.broadcasted_iota(jnp.int32, (batch_pad, 1), 0) < n_valid
            )

        # Stage the (lane-padded) latent into the activation slab.
        slab[:, 0:e_pad] = x_ref[...].astype(slab.dtype)

        prev_out = None   # freshest residual output (slab dtype), kept in regs
        prev_off = None   # its column offset in the slab
        for li, (in_w, off, out_w) in enumerate(layer_meta):
            w_ref = refs[1 + 3 * li]
            g_ref = refs[2 + 3 * li]
            b_ref = refs[3 + 3 * li]

            if prev_out is None:
                h = jnp.dot(slab[:, 0:in_w], w_ref[...],
                            preferred_element_type=jnp.float32)
            else:
                # Split K: dot over the stale prefix (independent of the
                # previous layer's BN/ReLU) + dot over the fresh segment.
                h = jnp.dot(slab[:, 0:prev_off], w_ref[0:prev_off, :],
                            preferred_element_type=jnp.float32)
                h = h + jnp.dot(prev_out, w_ref[prev_off:in_w, :],
                                preferred_element_type=jnp.float32)

            # BatchNorm1d (train mode, biased var) in ONE traversal of h.
            # (Linear bias omitted: mean subtraction cancels it exactly.)
            s1 = jnp.sum(h, axis=0, keepdims=True)
            s2 = jnp.sum(h * h, axis=0, keepdims=True)
            mean = s1 * inv_n
            var = jnp.maximum(s2 * inv_n - mean * mean, 0.0)
            scale = g_ref[...] * jax.lax.rsqrt(var + EPS)          # rsqrt -> EUP
            out = jnp.maximum((h - mean) * scale + b_ref[...], 0.0)  # BN + ReLU
            if need_mask:
                out = jnp.where(row_mask, out, 0.0)   # keep padded rows zero
            out = out.astype(slab.dtype)
            slab[:, off:off + out_w] = out            # 128-aligned store
            prev_out, prev_off = out, off

        if prev_out is None:
            acc = jnp.dot(slab[...], wf_ref[...],
                          preferred_element_type=jnp.float32)
        else:
            acc = jnp.dot(slab[:, 0:prev_off], wf_ref[0:prev_off, :],
                          preferred_element_type=jnp.float32)
            acc = acc + jnp.dot(prev_out, wf_ref[prev_off:, :],
                                preferred_element_type=jnp.float32)
        out_ref[...] = (acc + bf_ref[...]).astype(out_ref.dtype)

    return kernel


# ---------------------------------------------------------------------------
# Host-side layout plumbing (weight-row permutation + lane padding), run ONCE.
# ---------------------------------------------------------------------------
def _prepare(params, embedding_dim, use_bf16):
    res = params["residuals"]
    outs = [int(p["w"].shape[1]) for p in res]          # o_1 .. o_L
    L = len(outs)

    e_pad = _ceil_to(embedding_dim, LANE)
    o_pads = [_ceil_to(o, LANE) for o in outs]

    # Slab segment offsets: [x, out_1, ..., out_L]
    widths_pad = [e_pad] + o_pads
    seg_off = [0]
    for w in widths_pad[:-1]:
        seg_off.append(seg_off[-1] + w)
    total_pad = seg_off[-1] + widths_pad[-1]

    w_dtype = jnp.bfloat16 if use_bf16 else jnp.float32

    def reorder_pad_w(w, num_prev, out_pad):
        """Reference row order is [out_num_prev, ..., out_1, x]; slab order is
        [x, out_1, ..., out_num_prev].  Rows/cols for padded lanes are zero."""
        _, o = w.shape
        in_pad = e_pad + sum(o_pads[:num_prev])
        wp = jnp.zeros((in_pad, out_pad), jnp.float32)
        x_start = sum(outs[:num_prev])                  # x block in reference order
        wp = wp.at[0:embedding_dim, 0:o].set(w[x_start:x_start + embedding_dim, :])
        for t in range(num_prev):                       # out_{t+1} block
            ref_start = sum(outs[t + 1:num_prev])
            wp = wp.at[seg_off[t + 1]:seg_off[t + 1] + outs[t], 0:o].set(
                w[ref_start:ref_start + outs[t], :])
        return wp.astype(w_dtype)

    layer_args, layer_meta = [], []
    for k, p in enumerate(res):
        o, o_pad = outs[k], o_pads[k]
        wp = reorder_pad_w(p["w"], k, o_pad)
        gp = jnp.zeros((1, o_pad), jnp.float32).at[:, :o].set(p["gamma"])
        bp = jnp.zeros((1, o_pad), jnp.float32).at[:, :o].set(p["beta"])
        # NOTE: p["b"] (Linear bias) is intentionally NOT passed: BatchNorm's
        # mean subtraction cancels any per-feature constant exactly.
        layer_args += [wp, gp, bp]
        layer_meta.append((e_pad + sum(o_pads[:k]), seg_off[k + 1], o_pad))

    data_dim = int(params["final"]["w"].shape[1])
    d_pad = _ceil_to(data_dim, LANE)
    wf = reorder_pad_w(params["final"]["w"], L, d_pad)
    bf = jnp.zeros((1, d_pad), jnp.float32).at[:, :data_dim].set(params["final"]["b"])

    return dict(layer_args=layer_args, layer_meta=tuple(layer_meta), wf=wf, bf=bf,
                e_pad=e_pad, total_pad=total_pad, d_pad=d_pad, data_dim=data_dim)


def build_generator_forward(params, embedding_dim, use_bf16=True):
    """Prep/permute/pad weights ONCE; return a jitted forward(x) callable."""
    prep = _prepare(params, embedding_dim, use_bf16)
    flat_w = tuple(prep["layer_args"]) + (prep["wf"], prep["bf"])
    layer_meta = prep["layer_meta"]
    e_pad, total_pad = prep["e_pad"], prep["total_pad"]
    d_pad, data_dim = prep["d_pad"], prep["data_dim"]
    slab_dtype = jnp.bfloat16 if use_bf16 else jnp.float32
    x_dtype = jnp.bfloat16 if use_bf16 else jnp.float32
    batch_align = 16 if use_bf16 else 8      # sublane multiple per operand dtype

    @jax.jit
    def _fwd(x, *weights):
        batch, e = x.shape
        batch_pad = _ceil_to(batch, batch_align)

        # Lane/sublane-padded latent, already in the matmul operand dtype
        # (halves the biggest activation DMA on the bf16 path).
        x_pad = jnp.zeros((batch_pad, e_pad), x_dtype).at[:batch, :e].set(
            x.astype(x_dtype))
        inputs = (x_pad,) + weights

        # VMEM budget: everything is resident once (no grid, no double-buffer).
        in_bytes = sum(int(a.size) * a.dtype.itemsize for a in inputs)
        slab_bytes = batch_pad * total_pad * jnp.dtype(slab_dtype).itemsize
        out_bytes = batch_pad * d_pad * 4
        max_ow = max((ow for _, _, ow in layer_meta), default=d_pad)
        tmp_bytes = 4 * batch_pad * max_ow * 4          # f32 h/out temporaries
        need = in_bytes + slab_bytes + out_bytes + tmp_bytes
        # >= 32 MiB helps v5e (16 MiB scoped default); <= 64 MiB fits v7x VMEM.
        vmem_limit = int(min(max(2 * need, 32 << 20), 64 << 20))

        flops = 2 * batch_pad * e_pad * (layer_meta[0][2] if layer_meta else d_pad)
        for iw, _, ow in layer_meta[1:]:
            flops += 2 * batch_pad * iw * ow
        flops += 2 * batch_pad * total_pad * d_pad
        cost = pl.CostEstimate(
            flops=flops,
            transcendentals=sum(ow for _, _, ow in layer_meta),
            bytes_accessed=in_bytes + out_bytes)

        vmem = pl.BlockSpec(memory_space=pltpu.MemorySpace.VMEM)
        out_pad = pl.pallas_call(
            _make_fused_kernel(layer_meta, e_pad, batch, batch_pad),
            out_shape=jax.ShapeDtypeStruct((batch_pad, d_pad), jnp.float32),
            in_specs=[vmem] * len(inputs),
            out_specs=vmem,
            scratch_shapes=[pltpu.VMEM((batch_pad, total_pad), slab_dtype)],
            compiler_params=pltpu.CompilerParams(vmem_limit_bytes=vmem_limit),
            cost_estimate=cost,
        )(*inputs)
        return out_pad[:batch, :data_dim]

    def forward(x):
        return _fwd(x, *flat_w)

    return forward


# ---------------------------------------------------------------------------
# Parameters + pure-JAX reference
# ---------------------------------------------------------------------------
def init_generator_params(key, embedding_dim, generator_dim, data_dim):
    params = {"residuals": []}
    dim = embedding_dim
    for item in generator_dim:
        key, k_w, k_b, k_g, k_be = jax.random.split(key, 5)
        params["residuals"].append(
            {
                "w": jax.random.normal(k_w, (dim, item), jnp.float32) * 0.1,
                "b": jax.random.normal(k_b, (1, item), jnp.float32) * 0.1,
                "gamma": 1.0 + 0.05 * jax.random.normal(k_g, (1, item), jnp.float32),
                "beta": 0.05 * jax.random.normal(k_be, (1, item), jnp.float32),
            }
        )
        dim += item
    key, k_w, k_b = jax.random.split(key, 3)
    params["final"] = {
        "w": jax.random.normal(k_w, (dim, data_dim), jnp.float32) * 0.1,
        "b": jax.random.normal(k_b, (1, data_dim), jnp.float32) * 0.1,
    }
    return params


def generator_forward_ref(x, params):
    """Pure-JAX reference mirroring the PyTorch module (train-mode BN)."""
    for p in params["residuals"]:
        h = x @ p["w"] + p["b"]
        mean = jnp.mean(h, axis=0, keepdims=True)
        var = jnp.mean((h - mean) ** 2, axis=0, keepdims=True)
        h = (h - mean) / jnp.sqrt(var + EPS) * p["gamma"] + p["beta"]
        h = jnp.maximum(h, 0.0)
        x = jnp.concatenate([h, x], axis=1)
    return x @ params["final"]["w"] + params["final"]["b"]


if __name__ == "__main__":
    embedding_dim = 32
    generator_dim = (32, 32)
    data_dim = 16
    batch = 8

    key = jax.random.PRNGKey(0)
    key, k_x = jax.random.split(key)
    x = jax.random.normal(k_x, (batch, embedding_dim), jnp.float32)
    params = init_generator_params(key, embedding_dim, generator_dim, data_dim)

    ref = generator_forward_ref(x, params)

    # f32 operand path: strict check vs reference (exercises unpadded batch).
    fwd_f32 = build_generator_forward(params, embedding_dim, use_bf16=False)
    out = jax.block_until_ready(fwd_f32(x))
    assert out.shape == (batch, data_dim), out.shape
    assert jnp.allclose(out, ref, atol=2e-4, rtol=2e-4), "f32 kernel mismatch vs reference"

    # bf16 operand path (default; good on v5e/v6e/v7x MXUs): looser tolerance.
    # Exercises batch padding (8 -> 16 sublanes) + masked BN statistics.
    fwd_bf16 = build_generator_forward(params, embedding_dim, use_bf16=True)
    out_bf16 = jax.block_until_ready(fwd_bf16(x))
    assert out_bf16.shape == (batch, data_dim), out_bf16.shape
    assert jnp.allclose(out_bf16, ref, atol=1e-1, rtol=1e-1), "bf16 kernel mismatch vs reference"

    # Second call reuses the cached, pre-permuted weights (no re-prep / retrace).
    out_bf16_2 = jax.block_until_ready(fwd_bf16(x))
    assert jnp.allclose(out_bf16_2, out_bf16), "cached-weight path mismatch"

    print("KERNEL_OK")
</pallas_src>

<mosaic_0001>
module attributes {stable_mosaic.version = 11 : i64} {
  func.func @kernel(%arg0: memref<8x128xf32, #tpu.memory_space<vmem>>, %arg1: memref<128x128xf32, #tpu.memory_space<vmem>>, %arg2: memref<1x128xf32, #tpu.memory_space<vmem>>, %arg3: memref<1x128xf32, #tpu.memory_space<vmem>>, %arg4: memref<256x128xf32, #tpu.memory_space<vmem>>, %arg5: memref<1x128xf32, #tpu.memory_space<vmem>>, %arg6: memref<1x128xf32, #tpu.memory_space<vmem>>, %arg7: memref<384x128xf32, #tpu.memory_space<vmem>>, %arg8: memref<1x128xf32, #tpu.memory_space<vmem>>, %arg9: memref<8x128xf32, #tpu.memory_space<vmem>>, %arg10: memref<8x384xf32, #tpu.memory_space<vmem>>) attributes {dimension_semantics = [], scalar_prefetch = 0 : i64, scratch_operands = 1 : i64, tpu.core_type = #tpu.core_type<tc>} {
    %c0 = arith.constant 0 : index
    %c0_0 = arith.constant 0 : index
    %0 = vector.load %arg0[%c0, %c0_0] : memref<8x128xf32, #tpu.memory_space<vmem>>, vector<8x128xf32>
    %c0_1 = arith.constant 0 : index
    %c0_2 = arith.constant 0 : index
    %1 = vector.load %arg10[%c0_1, %c0_2] : memref<8x384xf32, #tpu.memory_space<vmem>>, vector<8x128xf32>
    tpu.vector_store %arg10[%c0_1, %c0_2], %0 {strides = array<i32>} : memref<8x384xf32, #tpu.memory_space<vmem>>, vector<8x128xf32>,
    %c0_3 = arith.constant 0 : index
    %c0_4 = arith.constant 0 : index
    %2 = vector.load %arg10[%c0_3, %c0_4] : memref<8x384xf32, #tpu.memory_space<vmem>>, vector<8x128xf32>
    %c0_5 = arith.constant 0 : index
    %c0_6 = arith.constant 0 : index
    %3 = vector.load %arg1[%c0_5, %c0_6] : memref<128x128xf32, #tpu.memory_space<vmem>>, vector<128x128xf32>
    %cst = arith.constant dense<0.000000e+00> : vector<8x128xf32>
    %4 = tpu.matmul %2, %3, %cst {dimension_numbers = #tpu.dot_dimension_numbers<[1], [0], [0], [1], [0, 0, 1, 1], [], []>} : vector<8x128xf32>, vector<128x128xf32>, vector<8x128xf32> -> vector<8x128xf32>
    %cst_7 = arith.constant dense<0.000000e+00> : vector<128xf32>
    %5 = vector.multi_reduction <add>, %4, %cst_7 [0] : vector<8x128xf32> to vector<128xf32>
    %6 = vector.shape_cast %5 : vector<128xf32> to vector<1x128xf32>
    %7 = arith.mulf %4, %4 : vector<8x128xf32>
    %cst_8 = arith.constant dense<0.000000e+00> : vector<128xf32>
    %8 = vector.multi_reduction <add>, %7, %cst_8 [0] : vector<8x128xf32> to vector<128xf32>
    %9 = vector.shape_cast %8 : vector<128xf32> to vector<1x128xf32>
    %cst_9 = arith.constant 1.250000e-01 : f32
    %10 = vector.broadcast %cst_9 : f32 to vector<1x128xf32>
    %11 = arith.mulf %6, %10 : vector<1x128xf32>
    %cst_10 = arith.constant 1.250000e-01 : f32
    %12 = vector.broadcast %cst_10 : f32 to vector<1x128xf32>
    %13 = arith.mulf %9, %12 : vector<1x128xf32>
    %14 = arith.mulf %11, %11 : vector<1x128xf32>
    %15 = arith.subf %13, %14 : vector<1x128xf32>
    %cst_11 = arith.constant 0.000000e+00 : f32
    %16 = vector.broadcast %cst_11 : f32 to vector<1x128xf32>
    %17 = arith.maximumf %15, %16 : vector<1x128xf32>
    %c0_12 = arith.constant 0 : index
    %c0_13 = arith.constant 0 : index
    %18 = vector.load %arg2[%c0_12, %c0_13] : memref<1x128xf32, #tpu.memory_space<vmem>>, vector<1x128xf32>
    %cst_14 = arith.constant 9.99999974E-6 : f32
    %19 = vector.broadcast %cst_14 : f32 to vector<1x128xf32>
    %20 = arith.addf %17, %19 : vector<1x128xf32>
    %21 = math.rsqrt %20 : vector<1x128xf32>
    %22 = arith.mulf %18, %21 : vector<1x128xf32>
    %23 = vector.broadcast %11 : vector<1x128xf32> to vector<8x128xf32>
    %24 = arith.subf %4, %23 : vector<8x128xf32>
    %25 = vector.broadcast %22 : vector<1x128xf32> to vector<8x128xf32>
    %26 = arith.mulf %24, %25 : vector<8x128xf32>
    %c0_15 = arith.constant 0 : index
    %c0_16 = arith.constant 0 : index
    %27 = vector.load %arg3[%c0_15, %c0_16] : memref<1x128xf32, #tpu.memory_space<vmem>>, vector<1x128xf32>
    %28 = vector.broadcast %27 : vector<1x128xf32> to vector<8x128xf32>
    %29 = arith.addf %26, %28 : vector<8x128xf32>
    %cst_17 = arith.constant 0.000000e+00 : f32
    %30 = vector.broadcast %cst_17 : f32 to vector<8x128xf32>
    %31 = arith.maximumf %29, %30 : vector<8x128xf32>
    %c0_18 = arith.constant 0 : index
    %c128 = arith.constant 128 : index
    %32 = vector.load %arg10[%c0_18, %c128] : memref<8x384xf32, #tpu.memory_space<vmem>>, vector<8x128xf32>
    tpu.vector_store %arg10[%c0_18, %c128], %31 {strides = array<i32>} : memref<8x384xf32, #tpu.memory_space<vmem>>, vector<8x128xf32>,
    %c0_19 = arith.constant 0 : index
    %c0_20 = arith.constant 0 : index
    %33 = vector.load %arg10[%c0_19, %c0_20] : memref<8x384xf32, #tpu.memory_space<vmem>>, vector<8x128xf32>
    %c0_21 = arith.constant 0 : index
    %c0_22 = arith.constant 0 : index
    %34 = vector.load %arg4[%c0_21, %c0_22] : memref<256x128xf32, #tpu.memory_space<vmem>>, vector<128x128xf32>
    %cst_23 = arith.constant dense<0.000000e+00> : vector<8x128xf32>
    %35 = tpu.matmul %33, %34, %cst_23 {dimension_numbers = #tpu.dot_dimension_numbers<[1], [0], [0], [1], [0, 0, 1, 1], [], []>} : vector<8x128xf32>, vector<128x128xf32>, vector<8x128xf32> -> vector<8x128xf32>
    %c128_24 = arith.constant 128 : index
    %c0_25 = arith.constant 0 : index
    %36 = vector.load %arg4[%c128_24, %c0_25] : memref<256x128xf32, #tpu.memory_space<vmem>>, vector<128x128xf32>
    %cst_26 = arith.constant dense<0.000000e+00> : vector<8x128xf32>
    %37 = tpu.matmul %31, %36, %cst_26 {dimension_numbers = #tpu.dot_dimension_numbers<[1], [0], [0], [1], [0, 0, 1, 1], [], []>} : vector<8x128xf32>, vector<128x128xf32>, vector<8x128xf32> -> vector<8x128xf32>
    %38 = arith.addf %35, %37 : vector<8x128xf32>
    %cst_27 = arith.constant dense<0.000000e+00> : vector<128xf32>
    %39 = vector.multi_reduction <add>, %38, %cst_27 [0] : vector<8x128xf32> to vector<128xf32>
    %40 = vector.shape_cast %39 : vector<128xf32> to vector<1x128xf32>
    %41 = arith.mulf %38, %38 : vector<8x128xf32>
    %cst_28 = arith.constant dense<0.000000e+00> : vector<128xf32>
    %42 = vector.multi_reduction <add>, %41, %cst_28 [0] : vector<8x128xf32> to vector<128xf32>
    %43 = vector.shape_cast %42 : vector<128xf32> to vector<1x128xf32>
    %cst_29 = arith.constant 1.250000e-01 : f32
    %44 = vector.broadcast %cst_29 : f32 to vector<1x128xf32>
    %45 = arith.mulf %40, %44 : vector<1x128xf32>
    %cst_30 = arith.constant 1.250000e-01 : f32
    %46 = vector.broadcast %cst_30 : f32 to vector<1x128xf32>
    %47 = arith.mulf %43, %46 : vector<1x128xf32>
    %48 = arith.mulf %45, %45 : vector<1x128xf32>
    %49 = arith.subf %47, %48 : vector<1x128xf32>
    %cst_31 = arith.constant 0.000000e+00 : f32
    %50 = vector.broadcast %cst_31 : f32 to vector<1x128xf32>
    %51 = arith.maximumf %49, %50 : vector<1x128xf32>
    %c0_32 = arith.constant 0 : index
    %c0_33 = arith.constant 0 : index
    %52 = vector.load %arg5[%c0_32, %c0_33] : memref<1x128xf32, #tpu.memory_space<vmem>>, vector<1x128xf32>
    %cst_34 = arith.constant 9.99999974E-6 : f32
    %53 = vector.broadcast %cst_34 : f32 to vector<1x128xf32>
    %54 = arith.addf %51, %53 : vector<1x128xf32>
    %55 = math.rsqrt %54 : vector<1x128xf32>
    %56 = arith.mulf %52, %55 : vector<1x128xf32>
    %57 = vector.broadcast %45 : vector<1x128xf32> to vector<8x128xf32>
    %58 = arith.subf %38, %57 : vector<8x128xf32>
    %59 = vector.broadcast %56 : vector<1x128xf32> to vector<8x128xf32>
    %60 = arith.mulf %58, %59 : vector<8x128xf32>
    %c0_35 = arith.constant 0 : index
    %c0_36 = arith.constant 0 : index
    %61 = vector.load %arg6[%c0_35, %c0_36] : memref<1x128xf32, #tpu.memory_space<vmem>>, vector<1x128xf32>
    %62 = vector.broadcast %61 : vector<1x128xf32> to vector<8x128xf32>
    %63 = arith.addf %60, %62 : vector<8x128xf32>
    %cst_37 = arith.constant 0.000000e+00 : f32
    %64 = vector.broadcast %cst_37 : f32 to vector<8x128xf32>
    %65 = arith.maximumf %63, %64 : vector<8x128xf32>
    %c0_38 = arith.constant 0 : index
    %c256 = arith.constant 256 : index
    %66 = vector.load %arg10[%c0_38, %c256] : memref<8x384xf32, #tpu.memory_space<vmem>>, vector<8x128xf32>
    tpu.vector_store %arg10[%c0_38, %c256], %65 {strides = array<i32>} : memref<8x384xf32, #tpu.memory_space<vmem>>, vector<8x128xf32>,
    %c0_39 = arith.constant 0 : index
    %c0_40 = arith.constant 0 : index
    %67 = vector.load %arg10[%c0_39, %c0_40] : memref<8x384xf32, #tpu.memory_space<vmem>>, vector<8x256xf32>
    %c0_41 = arith.constant 0 : index
    %c0_42 = arith.constant 0 : index
    %68 = vector.load %arg7[%c0_41, %c0_42] : memref<384x128xf32, #tpu.memory_space<vmem>>, vector<256x128xf32>
    %cst_43 = arith.constant dense<0.000000e+00> : vector<8x128xf32>
    %69 = tpu.matmul %67, %68, %cst_43 {dimension_numbers = #tpu.dot_dimension_numbers<[1], [0], [0], [1], [0, 0, 1, 1], [], []>} : vector<8x256xf32>, vector<256x128xf32>, vector<8x128xf32> -> vector<8x128xf32>
    %c256_44 = arith.constant 256 : index
    %c0_45 = arith.constant 0 : index
    %70 = vector.load %arg7[%c256_44, %c0_45] : memref<384x128xf32, #tpu.memory_space<vmem>>, vector<128x128xf32>
    %cst_46 = arith.constant dense<0.000000e+00> : vector<8x128xf32>
    %71 = tpu.matmul %65, %70, %cst_46 {dimension_numbers = #tpu.dot_dimension_numbers<[1], [0], [0], [1], [0, 0, 1, 1], [], []>} : vector<8x128xf32>, vector<128x128xf32>, vector<8x128xf32> -> vector<8x128xf32>
    %72 = arith.addf %69, %71 : vector<8x128xf32>
    %c0_47 = arith.constant 0 : index
    %c0_48 = arith.constant 0 : index
    %73 = vector.load %arg8[%c0_47, %c0_48] : memref<1x128xf32, #tpu.memory_space<vmem>>, vector<1x128xf32>
    %74 = vector.broadcast %73 : vector<1x128xf32> to vector<8x128xf32>
    %75 = arith.addf %72, %74 : vector<8x128xf32>
    %c0_49 = arith.constant 0 : index
    %c0_50 = arith.constant 0 : index
    %76 = vector.load %arg9[%c0_49, %c0_50] : memref<8x128xf32, #tpu.memory_space<vmem>>, vector<8x128xf32>
    tpu.vector_store %arg9[%c0_49, %c0_50], %75 {strides = array<i32>} : memref<8x128xf32, #tpu.memory_space<vmem>>, vector<8x128xf32>,
    return
  }
}

</mosaic_0001>

<bundles_post_ra>
// kernel: _fwd.1
= control target key start
LH: loop header
LB: loop body
LE: loop exit
PB: predicated region body
PF: predicated region fallthrough
CT: control target
= control target key end

     0   :  { %14 = vsyncpa [#allocation4], 0  ;;  %s1314_s0 = inlined_call_operand.vmem [shape: f32[8,128], index: 0, kind: input, shape index: {}]   ;;  %s1315_s1 = inlined_call_operand.hbm [shape: f32[128,128], index: 1, kind: input, shape index: {}]   ;;  %s1316_s2 = inlined_call_operand.vmem [shape: f32[1,128], index: 2, kind: input, shape index: {}]   ;;  %s1317_s3 = inlined_call_operand.vmem [shape: f32[1,128], index: 3, kind: input, shape index: {}]   ;;  %s1318_s4 = inlined_call_operand.hbm [shape: f32[256,128], index: 4, kind: input, shape index: {}]   ;;  %s1319_s5 = inlined_call_operand.vmem [shape: f32[1,128], index: 5, kind: input, shape index: {}]   ;;  %s1320_s6 = inlined_call_operand.vmem [shape: f32[1,128], index: 6, kind: input, shape index: {}]   ;;  %s1321_s7 = inlined_call_operand.hbm [shape: f32[384,128], index: 7, kind: input, shape index: {}]   ;;  %s1322_s8 = inlined_call_operand.vmem [shape: f32[1,128], index: 8, kind: input, shape index: {}]   ;;  %s1323_s9 = inlined_call_operand.hbm [shape: f32[8,128], index: 9, kind: output, shape index: {}]  }
   0x1   :  { %15 = vsyncpa [#allocation7], 0 }
   0x2   :  { %16 = vsyncpa [#allocation5], 0  ;;  %s1114_s30 = smov [#allocation6]   ;;  %s1115_s11 = smov [#allocation3]  }
   0x3   :  { %s40_s10 = sshll.u32 %s1114_s30, 4  ;;  %s24_s12 = sshll.u32 %s1115_s11, 4  ;;  %s41_s10 = int_to_ptr.vmem [resolvable:$true] %s40_s10  ;;  %s1173_s12 = int_to_ptr.vmem [resolvable:$true] %s24_s12 }
   0x4   :  { %s1020_s15 = scalar_lea.hbm %s1318_s4, 4096 }
   0x5   :  { %p1021_p0 = scmp.ne.s32.totalorder %s1318_s4, %s1020_s15  ;;  %p1024_p1 = scmp.lt.u32.totalorder %s1020_s15, %s1318_s4 }
   0x7   :  { %p1026_p2 = pnand %p1024_p1, %p1021_p0 }
   0x9   :  { %1029 = shalt.err (!%p1026_p2)
}
   0xa   :  { %s1030_s20 = scalar_lea.vmem %s41_s10, 4096  ;;  %p1035_p4 = scmp.lt.s32.totalorder %s41_s10, %s41_s10 }
   0xb   :  { %p1031_p3 = scmp.ne.s32.totalorder %s41_s10, %s1030_s20  ;;  %p1036_p5 = scmp.lt.s32.totalorder %s1030_s20, %s1030_s20 }
   0xd   :  { %p1037_p6 = por %p1036_p5, %p1035_p4 }
   0xf   :  { %p1038_p7 = pnand %p1037_p6, %p1031_p3 }
  0x11   :  { %1041 = shalt.err (!%p1038_p7)
}
  0x12   :  { %s1116_s21 = smov 128   ;;  %s1117_s22 = smov 8  }
  0x13   :  { %46 = dma.hbm_to_vmem [thread:$0]  %s1318_s4, 4096, %s41_s10, [#allocation7], %s1116_s21, %s1116_s21, %s1117_s22  }
  0x14   :  { %s1042_s27 = scalar_lea.hbm %s1315_s1, 2048 }
  0x15   :  { %p1043_p8 = scmp.ne.s32.totalorder %s1315_s1, %s1042_s27  ;;  %p1046_p9 = scmp.lt.u32.totalorder %s1042_s27, %s1315_s1 }
  0x17   :  { %p1048_p10 = pnand %p1046_p9, %p1043_p8 }
  0x19   :  { %1051 = shalt.err (!%p1048_p10)
}
  0x1a   :  { %s1052_s13 = scalar_lea.vmem %s1173_s12, 2048  ;;  %p1057_p12 = scmp.lt.s32.totalorder %s1173_s12, %s1173_s12 }
  0x1b   :  { %p1053_p11 = scmp.ne.s32.totalorder %s1173_s12, %s1052_s13  ;;  %p1058_p13 = scmp.lt.s32.totalorder %s1052_s13, %s1052_s13 }
  0x1d   :  { %p1059_p0 = por %p1058_p13, %p1057_p12 }
  0x1f   :  { %p1060_p1 = pnand %p1059_p0, %p1053_p11 }
  0x21   :  { %1063 = shalt.err (!%p1060_p1)
}
  0x22   :  { %30 = dma.hbm_to_vmem [thread:$0]  %s1315_s1, 2048, %s1173_s12, [#allocation4], %s1116_s21, %s1116_s21, %s1117_s22  }
  0x23   :  { %s1118_s14 = smov [#allocation8]   ;;  %s1064_s18 = scalar_lea.hbm %s1321_s7, 6144 }
  0x24   :  { %s56_s15 = sshll.u32 %s1118_s14, 4  ;;  %p1065_p2 = scmp.ne.s32.totalorder %s1321_s7, %s1064_s18  ;;  %s57_s15 = int_to_ptr.vmem [resolvable:$true] %s56_s15 }
  0x25   :  { %p1068_p3 = scmp.lt.u32.totalorder %s1064_s18, %s1321_s7 }
  0x27   :  { %p1070_p4 = pnand %p1068_p3, %p1065_p2 }
  0x29   :  { %1073 = shalt.err (!%p1070_p4)
}
  0x2a   :  { %s1074_s25 = scalar_lea.vmem %s57_s15, 6144  ;;  %p1079_p6 = scmp.lt.s32.totalorder %s57_s15, %s57_s15 }
  0x2b   :  { %p1075_p5 = scmp.ne.s32.totalorder %s57_s15, %s1074_s25  ;;  %p1080_p7 = scmp.lt.s32.totalorder %s1074_s25, %s1074_s25 }
  0x2d   :  { %p1081_p8 = por %p1080_p7, %p1079_p6 }
  0x2f   :  { %p1082_p9 = pnand %p1081_p8, %p1075_p5 }
  0x31   :  { %1085 = shalt.err (!%p1082_p9)
}
  0x32   :  { %62 = dma.hbm_to_vmem [thread:$0]  %s1321_s7, 6144, %s57_s15, [#allocation7], %s1116_s21, %s1116_s21, %s1117_s22  }
  0x33   :  { %1108 = dma.done.wait [#allocation4], 2048  }
  0x34   :  { %1109 = vsyncadd [#allocation4], 4294965248 }
  0x35   :  { %1110 = dma.done.wait [#allocation7], 10240  }
  0x36   :  { %1111 = vsyncadd [#allocation7], 4294957056  ;;  %v1119_v0 = vmov 0.0|0.0   ;;  %vm1120_vm0 = vmmov 0   ;;  %v1121_v1 = vmov 0.0   ;;  %v77_v2 = vld [vmem:[#allocation3] sm:$0xff] }
  0x37   :  { %877 = vmatprep.subr.bf16.mxu0 %v1119_v0  ;;  %769 = vmatprep.mubr.msk.f32.mxu0 %vm1120_vm0, %v1121_v1  ;;  %v78_v3 = vld [vmem:[#allocation3 + $0x8] sm:$0xff]  ;;  %v79_v4 = vld [vmem:[#allocation3 + $0x10] sm:$0xff]  ;;  %v80_v6 = vld [vmem:[#allocation3 + $0x18] sm:$0xff]  ;;  %s1122_s30 = smov [#allocation9]  }
  0x38   :  { %901 = vmatprep.subr.bf16.mxu1 %v1119_v0  ;;  %804 = vmatprep.mubr.msk.f32.mxu1 %vm1120_vm0, %v1121_v1  ;;  %v878_v5 = vpack.c.bf16 %v78_v3, %v77_v2  ;;  %v881_v7 = vpack.c.bf16 %v80_v6, %v79_v4  ;;  %v81_v8 = vld [vmem:[#allocation3 + $0x20] sm:$0xff]  ;;  %v82_v9 = vld [vmem:[#allocation3 + $0x28] sm:$0xff]  ;;  %v83_v11 = vld [vmem:[#allocation3 + $0x30] sm:$0xff]  ;;  %s621_s11 = sshll.u32 %s1122_s30, 4  ;;  %s622_s11 = int_to_ptr.vmem [resolvable:$true] %s621_s11 }
  0x39   :  { %v884_v10 = vpack.c.bf16 %v82_v9, %v81_v8  ;;  %v84_v12 = vld [vmem:[#allocation3 + $0x38] sm:$0xff]  ;;  %v85_v14 = vld [vmem:[#allocation3 + $0x40] sm:$0xff]  ;;  %v86_v15 = vld [vmem:[#allocation3 + $0x48] sm:$0xff]  ;;  %s1086_s13 = scalar_lea.vmem %s622_s11, 128  ;;  %p1091_p11 = scmp.lt.s32.totalorder %s622_s11, %s622_s11 }
  0x3a   :  { %879 = vmatpush3.bf16.msra.mxu0 %v878_v5  ;;  %v887_v13 = vpack.c.bf16 %v84_v12, %v83_v11  ;;  %v890_v16 = vpack.c.bf16 %v86_v15, %v85_v14  ;;  %v87_v17 = vld [vmem:[#allocation3 + $0x50] sm:$0xff]  ;;  %v88_v18 = vld [vmem:[#allocation3 + $0x58] sm:$0xff]  ;;  %v89_v20 = vld [vmem:[#allocation3 + $0x60] sm:$0xff]  ;;  %p1087_p10 = scmp.ne.s32.totalorder %s622_s11, %s1086_s13  ;;  %p1092_p12 = scmp.lt.s32.totalorder %s1086_s13, %s1086_s13 }
  0x3b   :  { %880 = vmatprep.subr.bf16.mxu0 %v1119_v0  ;;  %v893_v19 = vpack.c.bf16 %v88_v18, %v87_v17  ;;  %v90_v21 = vld [vmem:[#allocation3 + $0x68] sm:$0xff]  ;;  %v91_v23 = vld [vmem:[#allocation3 + $0x70] sm:$0xff]  ;;  %v92_v24 = vld [vmem:[#allocation3 + $0x78] sm:$0xff] }
  0x3c   :  { %v896_v22 = vpack.c.bf16 %v90_v21, %v89_v20  ;;  %v899_v25 = vpack.c.bf16 %v92_v24, %v91_v23  ;;  %v1241_v26 = vld [vmem:[%s1314_s0] sm:$0xff]  ;;  %v221_v28 = vld [vmem:[#allocation6 + $0x88] sm:$0xff]  ;;  %v222_v30 = vld [vmem:[#allocation6 + $0x90] sm:$0xff]  ;;  %p1093_p13 = por %p1092_p12, %p1091_p11 }
  0x3d   :  { %v220_v27 = vld [vmem:[#allocation6 + $0x80] sm:$0xff]  ;;  %v223_v31 = vld [vmem:[#allocation6 + $0x98] sm:$0xff]  ;;  %v225_v34 = vld [vmem:[#allocation6 + $0xa8] sm:$0xff] }
  0x3e   :  { %882 = vmatpush3.bf16.msra.mxu0 %v881_v7  ;;  %v902_v29 = vpack.c.bf16 %v221_v28, %v220_v27  ;;  %v905_v32 = vpack.c.bf16 %v223_v31, %v222_v30  ;;  %v224_v33 = vld [vmem:[#allocation6 + $0xa0] sm:$0xff]  ;;  %v226_v36 = vld [vmem:[#allocation6 + $0xb0] sm:$0xff]  ;;  %v227_v37 = vld [vmem:[#allocation6 + $0xb8] sm:$0xff]  ;;  %p1094_p0 = pnand %p1093_p13, %p1087_p10 }
  0x3f   :  { %883 = vmatprep.subr.bf16.mxu0 %v1119_v0  ;;  %v908_v35 = vpack.c.bf16 %v225_v34, %v224_v33  ;;  %v911_v38 = vpack.c.bf16 %v227_v37, %v226_v36  ;;  %v228_v39 = vld [vmem:[#allocation6 + $0xc0] sm:$0xff]  ;;  %v229_v40 = vld [vmem:[#allocation6 + $0xc8] sm:$0xff]  ;;  %v230_v42 = vld [vmem:[#allocation6 + $0xd0] sm:$0xff] }
  0x40   :  { %903 = vmatpush3.bf16.msra.mxu1 %v902_v29  ;;  %v914_v41 = vpack.c.bf16 %v229_v40, %v228_v39  ;;  %v231_v43 = vld [vmem:[#allocation6 + $0xd8] sm:$0xff]  ;;  %v232_v45 = vld [vmem:[#allocation6 + $0xe0] sm:$0xff]  ;;  %v233_v46 = vld [vmem:[#allocation6 + $0xe8] sm:$0xff] }
  0x41   :  { %904 = vmatprep.subr.bf16.mxu1 %v1119_v0  ;;  %v917_v44 = vpack.c.bf16 %v231_v43, %v230_v42  ;;  %v920_v47 = vpack.c.bf16 %v233_v46, %v232_v45  ;;  %v234_v48 = vld [vmem:[#allocation6 + $0xf0] sm:$0xff]  ;;  %v235_v49 = vld [vmem:[#allocation6 + $0xf8] sm:$0xff]  ;;  %v181_v12 = vld [vmem:[%s1316_s2] sm:$0x1] }
  0x42   :  { %885 = vmatpush3.bf16.msra.mxu0 %v884_v10  ;;  %v923_v50 = vpack.c.bf16 %v235_v49, %v234_v48  ;;  %v187_v10 = vlaneseq  ;;  %v631_v18 = vld [vmem:[%s1317_s3] ss:$0 sm:$0xff]  ;;  %v205_v21 = vld [vmem:[#allocation6 + $0x8] sm:$0xff]  ;;  %v207_v27 = vld [vmem:[#allocation6 + $0x18] sm:$0xff] }
  0x43   :  { %886 = vmatprep.subr.bf16.mxu0 %v1119_v0  ;;  %v204_v20 = vld [vmem:[#allocation6] sm:$0xff]  ;;  %v209_v30 = vld [vmem:[#allocation6 + $0x28] sm:$0xff]  ;;  %v211_v33 = vld [vmem:[#allocation6 + $0x38] sm:$0xff] }
  0x44   :  { %906 = vmatpush3.bf16.msra.mxu1 %v905_v32  ;;  %v1255_v11 = vshrl.u32 %v187_v10, 7  ;;  %v926_v23 = vpack.c.bf16 %v205_v21, %v204_v20  ;;  %v208_v29 = vld [vmem:[#allocation6 + $0x20] sm:$0xff]  ;;  %v210_v32 = vld [vmem:[#allocation6 + $0x30] sm:$0xff]  ;;  %v213_v36 = vld [vmem:[#allocation6 + $0x48] sm:$0xff] }
  0x45   :  { %907 = vmatprep.subr.bf16.mxu1 %v1119_v0  ;;  %v932_v31 = vpack.c.bf16 %v209_v30, %v208_v29  ;;  %v935_v34 = vpack.c.bf16 %v211_v33, %v210_v32  ;;  %v216_v40 = vld [vmem:[#allocation6 + $0x60] sm:$0xff]  ;;  %v218_v43 = vld [vmem:[#allocation6 + $0x70] sm:$0xff] }
  0x46   :  { %888 = vmatpush3.bf16.msra.mxu0 %v887_v13  ;;  %v189_v13 = vsub.s32 0, %v1255_v11  ;;  %v450_v46 = vld [vmem:[#allocation8 + $0x100] sm:$0xff]  ;;  %v452_v49 = vld [vmem:[#allocation8 + $0x110] sm:$0xff] }
  0x47   :  { %889 = vmatprep.subr.bf16.mxu0 %v1119_v0 }
  0x48   :  { %909 = vmatpush3.bf16.msra.mxu1 %v908_v35  ;;  %v212_v35 = vld [vmem:[#allocation6 + $0x40] sm:$0xff] }
  0x49   :  { %910 = vmatprep.subr.bf16.mxu1 %v1119_v0  ;;  %v938_v37 = vpack.c.bf16 %v213_v36, %v212_v35  ;;  %v394_v36 = vld [vmem:[%s1319_s5] sm:$0x1] }
  0x4a   :  { %891 = vmatpush3.bf16.msra.mxu0 %v890_v16 }
  0x4b   :  { %892 = vmatprep.subr.bf16.mxu0 %v1119_v0 }
  0x4c   :  { %912 = vmatpush3.bf16.msra.mxu1 %v911_v38  ;;  %v215_v38 = vld [vmem:[#allocation6 + $0x58] sm:$0xff] }
  0x4d   :  { %913 = vmatprep.subr.bf16.mxu1 %v1119_v0 }
  0x4e   :  { %894 = vmatpush3.bf16.msra.mxu0 %v893_v19 }
  0x4f   :  { %895 = vmatprep.subr.bf16.mxu0 %v1119_v0 }
  0x50   :  { %915 = vmatpush3.bf16.msra.mxu1 %v914_v41  ;;  %v217_v41 = vld [vmem:[#allocation6 + $0x68] sm:$0xff] }
  0x51   :  { %916 = vmatprep.subr.bf16.mxu1 %v1119_v0  ;;  %v944_v42 = vpack.c.bf16 %v217_v41, %v216_v40  ;;  %v632_v40 = vld [vmem:[%s1320_s6] ss:$0 sm:$0xff] }
  0x52   :  { %897 = vmatpush3.bf16.msra.mxu0 %v896_v22 }
  0x53   :  { %898 = vmatprep.subr.bf16.mxu0 %v1119_v0 }
  0x54   :  { %918 = vmatpush3.bf16.msra.mxu1 %v917_v44  ;;  %v219_v44 = vld [vmem:[#allocation6 + $0x78] sm:$0xff] }
  0x55   :  { %919 = vmatprep.subr.bf16.mxu1 %v1119_v0  ;;  %v947_v45 = vpack.c.bf16 %v219_v44, %v218_v43  ;;  %v419_v43 = vld [vmem:[#allocation8 + $0x8] sm:$0xff]  ;;  %v436_v44 = vld [vmem:[#allocation8 + $0x90] sm:$0xff] }
  0x56   :  { %900 = vmatpush3.bf16.msra.mxu0 %v899_v25  ;;  %v206_v25 = vld [vmem:[#allocation6 + $0x10] sm:$0xff] }
  0x57   :  { %949 = vmatprep.subr.bf16.mxu0 %v1119_v0  ;;  %v929_v28 = vpack.c.bf16 %v207_v27, %v206_v25 }
  0x58   :  { %921 = vmatpush3.bf16.msra.mxu1 %v920_v47  ;;  %v451_v47 = vld [vmem:[#allocation8 + $0x108] sm:$0xff] }
  0x59   :  { %770 = vmatmul.mubr.f32.vlgmr.msra.gmra.mrb[0].mxu0 %v1241_v26  ;;  %922 = vmatprep.subr.bf16.mxu1 %v1119_v0  ;;  %v950_v48 = vpack.c.bf16 %v451_v47, %v450_v46 }
  0x5a   :  { %874 = vmatprep.mubr.msk.f32.mxu0 %vm1120_vm0, %v1121_v1 }
  0x5b   :  { %951 = vmatpush3.bf16.msra.mxu0 %v950_v48 }
  0x5c   :  { %924 = vmatpush3.bf16.msra.mxu1 %v923_v50  ;;  %952 = vmatprep.subr.bf16.mxu0 %v1119_v0  ;;  %v453_v50 = vld [vmem:[#allocation8 + $0x118] sm:$0xff] }
  0x5d   :  { %925 = vmatprep.subr.bf16.mxu1 %v1119_v0 }
 0x12c   :  { %v159_v51 = vpop.f32.mrb[0].mxu0 }
 0x12d   :  { %v163_v52 = vrot.slane %v159_v51, 4  ;;  %v169_v53 = vmul.f32 %v159_v51, %v159_v51  ;;  %v771_v54 = vpop.f32.mrb[1].mxu0 }
 0x12f   :  { %v164_v55 = vadd.f32 %v163_v52, %v159_v51  ;;  %v170_v56 = vrot.slane %v169_v53, 4  ;;  %v454_v52 = vld [vmem:[#allocation8 + $0x120] sm:$0xff] }
 0x131   :  { %v165_v57 = vrot.slane %v164_v55, 2  ;;  %v171_v58 = vadd.f32 %v170_v56, %v169_v53  ;;  %v455_v53 = vld [vmem:[#allocation8 + $0x128] sm:$0xff]  ;;  %v457_v56 = vld [vmem:[#allocation8 + $0x138] sm:$0xff] }
 0x132   :  { %v956_v54 = vpack.c.bf16 %v455_v53, %v454_v52  ;;  %v438_v52 = vld [vmem:[#allocation8 + $0xa0] sm:$0xff]  ;;  %v439_v53 = vld [vmem:[#allocation8 + $0xa8] sm:$0xff] }
 0x133   :  { %v166_v59 = vadd.f32 %v165_v57, %v164_v55  ;;  %v172_v60 = vrot.slane %v171_v58, 2  ;;  %v456_v55 = vld [vmem:[#allocation8 + $0x130] sm:$0xff] }
 0x134   :  { %v959_v57 = vpack.c.bf16 %v457_v56, %v456_v55  ;;  %v423_v55 = vld [vmem:[#allocation8 + $0x28] sm:$0xff]  ;;  %v440_v56 = vld [vmem:[#allocation8 + $0xb0] sm:$0xff] }
 0x135   :  { %v167_v61 = vrot.slane %v166_v59, 1  ;;  %v173_v62 = vadd.f32 %v172_v60, %v171_v58  ;;  %v458_v58 = vld [vmem:[#allocation8 + $0x140] sm:$0xff] }
 0x137   :  { %v168_v63 = vadd.f32 %v167_v61, %v166_v59  ;;  %v174_v2 = vrot.slane %v173_v62, 1  ;;  %v459_v59 = vld [vmem:[#allocation8 + $0x148] sm:$0xff]  ;;  %v460_v61 = vld [vmem:[#allocation8 + $0x150] sm:$0xff] }
 0x138   :  { %v962_v60 = vpack.c.bf16 %v459_v59, %v458_v58 }
 0x139   :  { %v175_v3 = vadd.f32 %v174_v2, %v173_v62  ;;  %v176_v4 = vmul.f32 0.125, %v168_v63  ;;  %v461_v62 = vld [vmem:[#allocation8 + $0x158] sm:$0xff]  ;;  %v462_v2 = vld [vmem:[#allocation8 + $0x160] sm:$0xff] }
 0x13a   :  { %v965_v63 = vpack.c.bf16 %v461_v62, %v460_v61  ;;  %v425_v61 = vld [vmem:[#allocation8 + $0x38] sm:$0xff]  ;;  %v442_v62 = vld [vmem:[#allocation8 + $0xc0] sm:$0xff] }
 0x13b   :  { %v177_v5 = vmul.f32 0.125, %v175_v3  ;;  %v178_v6 = vmul.f32 %v176_v4, %v176_v4  ;;  %v185_v16 = vsub.f32 %v159_v51, %v176_v4  ;;  %v953_v51 = vpack.c.bf16 %v453_v50, %v452_v49  ;;  %v463_v3 = vld [vmem:[#allocation8 + $0x168] sm:$0xff]  ;;  %v420_v50 = vld [vmem:[#allocation8 + $0x10] sm:$0xff] }
 0x13c   :  { %v968_v4 = vpack.c.bf16 %v463_v3, %v462_v2  ;;  %v427_v3 = vld [vmem:[#allocation8 + $0x48] sm:$0xff] }
 0x13d   :  { %v179_v7 = vsub.f32 %v177_v5, %v178_v6  ;;  %954 = vmatpush3.bf16.msra.mxu0 %v953_v51  ;;  %v464_v5 = vld [vmem:[#allocation8 + $0x170] sm:$0xff]  ;;  %v465_v6 = vld [vmem:[#allocation8 + $0x178] sm:$0xff] }
 0x13e   :  { %955 = vmatprep.subr.bf16.mxu0 %v1119_v0  ;;  %v421_v51 = vld [vmem:[#allocation8 + $0x18] sm:$0xff] }
 0x13f   :  { %v180_v8 = vmax.f32 %v179_v7, 0.0  ;;  %v971_v7 = vpack.c.bf16 %v465_v6, %v464_v5  ;;  %v979_v11 = vpack.c.bf16 %v421_v51, %v420_v50  ;;  %v445_v5 = vld [vmem:[#allocation8 + $0xd8] sm:$0xff] }
 0x141   :  { %v182_v9 = vadd.f32 1e-05, %v180_v8  ;;  %957 = vmatpush3.bf16.msra.mxu0 %v956_v54  ;;  %v434_v8 = vld [vmem:[#allocation8 + $0x80] sm:$0xff] }
 0x142   :  { %958 = vmatprep.subr.bf16.mxu0 %v1119_v0  ;;  %v422_v54 = vld [vmem:[#allocation8 + $0x20] sm:$0xff] }
 0x143   :  { %1016 = vrsqrt.f32 %v182_v9  ;;  %v435_v9 = vld [vmem:[#allocation8 + $0x88] sm:$0xff]  ;;  %v983_v58 = vpack.c.bf16 %v423_v55, %v422_v54 }
 0x144   :  { %v973_v10 = vpack.c.bf16 %v435_v9, %v434_v8  ;;  %v428_v8 = vld [vmem:[#allocation8 + $0x50] sm:$0xff]  ;;  %v429_v9 = vld [vmem:[#allocation8 + $0x58] sm:$0xff] }
 0x145   :  { %960 = vmatpush3.bf16.msra.mxu0 %v959_v57  ;;  %v441_v57 = vld [vmem:[#allocation8 + $0xb8] sm:$0xff] }
 0x146   :  { %961 = vmatprep.subr.bf16.mxu0 %v1119_v0  ;;  %v985_v59 = vpack.c.bf16 %v441_v57, %v440_v56 }
 0x149   :  { %963 = vmatpush3.bf16.msra.mxu0 %v962_v60  ;;  %v424_v60 = vld [vmem:[#allocation8 + $0x30] sm:$0xff] }
 0x14a   :  { %964 = vmatprep.subr.bf16.mxu0 %v1119_v0  ;;  %v987_v2 = vpack.c.bf16 %v425_v61, %v424_v60 }
 0x14d   :  { %v1017_v14 = vpop.eup %1016  ;;  %966 = vmatpush3.bf16.msra.mxu0 %v965_v63  ;;  %v443_v63 = vld [vmem:[#allocation8 + $0xc8] sm:$0xff] }
 0x14e   :  { %v184_v15 = vmul.f32 %v1017_v14, %v181_v12  ;;  %967 = vmatprep.subr.bf16.mxu0 %v1119_v0 }
 0x150   :  { %v190_v17 = vrot.slane %v184_v15, %v189_v13 }
 0x151   :  { %969 = vmatpush3.bf16.msra.mxu0 %v968_v4  ;;  %v444_v4 = vld [vmem:[#allocation8 + $0xd0] sm:$0xff] }
 0x152   :  { %v192_v19 = vmul.f32 %v190_v17, %v185_v16  ;;  %970 = vmatprep.subr.bf16.mxu0 %v1119_v0 }
 0x154   :  { %v1266_v22 = vadd.f32 %v631_v18, %v192_v19 }
 0x155   :  { %972 = vmatpush3.bf16.msra.mxu0 %v971_v7  ;;  %v993_v7 = vpack.c.bf16 %v445_v5, %v444_v4 }
 0x156   :  { %v201_v24 = vmax.f32 %v1266_v22, 0.0  ;;  %974 = vmatprep.subr.bf16.mxu0 %v973_v10  ;;  %v989_v22 = vpack.c.bf16 %v443_v63, %v442_v62  ;;  %v446_v10 = vld [vmem:[#allocation8 + $0xe0] sm:$0xff] }
 0x158   :  { %805 = vmatmul.mubr.f32.vlgmr.msra.gmra.mrb[0].mxu1 %v201_v24 }
 0x159   :  { %927 = vmatpush3.bf16.msra.mxu1 %v926_v23  ;;  %839 = vmatprep.mubr.msk.f32.mxu1 %vm1120_vm0, %v1121_v1  ;;  %v214_v1 = vld [vmem:[#allocation6 + $0x50] sm:$0xff] }
 0x15a   :  { %928 = vmatprep.subr.bf16.mxu1 %v1119_v0  ;;  %v941_v39 = vpack.c.bf16 %v215_v38, %v214_v1 }
 0x15d   :  { %930 = vmatpush3.bf16.msra.mxu1 %v929_v28 }
 0x15e   :  { %931 = vmatprep.subr.bf16.mxu1 %v1119_v0 }
 0x161   :  { %933 = vmatpush3.bf16.msra.mxu1 %v932_v31 }
 0x162   :  { %934 = vmatprep.subr.bf16.mxu1 %v1119_v0 }
 0x165   :  { %936 = vmatpush3.bf16.msra.mxu1 %v935_v34 }
 0x166   :  { %937 = vmatprep.subr.bf16.mxu1 %v1119_v0 }
 0x169   :  { %939 = vmatpush3.bf16.msra.mxu1 %v938_v37 }
 0x16a   :  { %940 = vmatprep.subr.bf16.mxu1 %v1119_v0 }
 0x16d   :  { %942 = vmatpush3.bf16.msra.mxu1 %v941_v39 }
 0x16e   :  { %943 = vmatprep.subr.bf16.mxu1 %v1119_v0 }
 0x171   :  { %945 = vmatpush3.bf16.msra.mxu1 %v944_v42  ;;  %v418_v42 = vld [vmem:[#allocation8] sm:$0xff] }
 0x172   :  { %946 = vmatprep.subr.bf16.mxu1 %v1119_v0  ;;  %v975_v47 = vpack.c.bf16 %v419_v43, %v418_v42 }
 0x175   :  { %948 = vmatpush3.bf16.msra.mxu1 %v947_v45  ;;  %v437_v45 = vld [vmem:[#allocation8 + $0x98] sm:$0xff] }
 0x176   :  { %v977_v49 = vpack.c.bf16 %v437_v45, %v436_v44 }
 0x178   :  { %840 = vmatmul.mubr.f32.vlgmr.msra.gmra.mrb[0].mxu1 %v1241_v26 }
 0x24b   :  { %v372_v12 = vpop.f32.mrb[0].mxu1 }
 0x24c   :  { %v376_v14 = vrot.slane %v372_v12, 4  ;;  %v382_v15 = vmul.f32 %v372_v12, %v372_v12  ;;  %v841_v16 = vpop.f32.mrb[1].mxu1 }
 0x24d   :  { %v430_v16 = vld [vmem:[#allocation8 + $0x60] sm:$0xff] }
 0x24e   :  { %v377_v17 = vadd.f32 %v376_v14, %v372_v12  ;;  %v383_v18 = vrot.slane %v382_v15, 4  ;;  %v995_v14 = vpack.c.bf16 %v429_v9, %v428_v8 }
 0x250   :  { %v378_v19 = vrot.slane %v377_v17, 2  ;;  %v384_v20 = vadd.f32 %v383_v18, %v382_v15  ;;  %v448_v18 = vld [vmem:[#allocation8 + $0xf0] sm:$0xff] }
 0x252   :  { %v379_v21 = vadd.f32 %v378_v19, %v377_v17  ;;  %v385_v23 = vrot.slane %v384_v20, 2  ;;  %v431_v17 = vld [vmem:[#allocation8 + $0x68] sm:$0xff]  ;;  %v449_v19 = vld [vmem:[#allocation8 + $0xf8] sm:$0xff] }
 0x254   :  { %v380_v25 = vrot.slane %v379_v21, 1  ;;  %v386_v0 = vadd.f32 %v385_v23, %v384_v20  ;;  %v999_v20 = vpack.c.bf16 %v431_v17, %v430_v16  ;;  %v432_v23 = vld [vmem:[#allocation8 + $0x70] sm:$0xff] }
 0x256   :  { %v381_v27 = vadd.f32 %v380_v25, %v379_v21  ;;  %v387_v28 = vrot.slane %v386_v0, 1  ;;  %v1001_v21 = vpack.c.bf16 %v449_v19, %v448_v18  ;;  %v433_v25 = vld [vmem:[#allocation8 + $0x78] sm:$0xff] }
 0x258   :  { %v388_v29 = vadd.f32 %v387_v28, %v386_v0  ;;  %v389_v30 = vmul.f32 0.125, %v381_v27  ;;  %v1003_v0 = vpack.c.bf16 %v433_v25, %v432_v23 }
 0x25a   :  { %v390_v31 = vmul.f32 0.125, %v388_v29  ;;  %v391_v32 = vmul.f32 %v389_v30, %v389_v30  ;;  %v398_v38 = vsub.f32 %v372_v12, %v389_v30  ;;  %v447_v12 = vld [vmem:[#allocation8 + $0xe8] sm:$0xff] }
 0x25b   :  { %v997_v15 = vpack.c.bf16 %v447_v12, %v446_v10 }
 0x25c   :  { %v392_v33 = vsub.f32 %v390_v31, %v391_v32  ;;  %v633_v32 = vld [vmem:[%s1322_s8] ss:$0 sm:$0xff] }
 0x25e   :  { %v393_v34 = vmax.f32 %v392_v33, 0.0 }
 0x260   :  { %v395_v35 = vadd.f32 1e-05, %v393_v34 }
 0x262   :  { %1018 = vrsqrt.f32 %v395_v35 }
 0x26c   :  { %v1019_v37 = vpop.eup %1018 }
 0x26d   :  { %v397_v1 = vmul.f32 %v1019_v37, %v394_v36 }
 0x26f   :  { %v403_v39 = vrot.slane %v397_v1, %v189_v13  ;;  %v981_v13 = vpack.c.bf16 %v439_v53, %v438_v52 }
 0x271   :  { %v405_v41 = vmul.f32 %v403_v39, %v398_v38 }
 0x273   :  { %v413_v46 = vadd.f32 %v632_v40, %v405_v41 }
 0x275   :  { %v414_v48 = vmax.f32 %v413_v46, 0.0 }
 0x277   :  { %875 = vmatmul.mubr.f32.vlgmr.msra.gmra.mrb[2].mxu0 %v414_v48 }
 0x278   :  { %976 = vmatpush3.bf16.msra.mxu0 %v975_v47  ;;  %600 = vmatprep.mubr.f32.mxu0 %v201_v24  ;;  %v426_v24 = vld [vmem:[#allocation8 + $0x40] sm:$0xff] }
 0x279   :  { %978 = vmatprep.subr.bf16.mxu0 %v977_v49  ;;  %v991_v6 = vpack.c.bf16 %v427_v3, %v426_v24 }
 0x27c   :  { %980 = vmatpush3.bf16.msra.mxu0 %v979_v11 }
 0x27d   :  { %982 = vmatprep.subr.bf16.mxu0 %v981_v13 }
 0x280   :  { %984 = vmatpush3.bf16.msra.mxu0 %v983_v58 }
 0x281   :  { %986 = vmatprep.subr.bf16.mxu0 %v985_v59 }
 0x284   :  { %988 = vmatpush3.bf16.msra.mxu0 %v987_v2 }
 0x285   :  { %990 = vmatprep.subr.bf16.mxu0 %v989_v22 }
 0x288   :  { %992 = vmatpush3.bf16.msra.mxu0 %v991_v6 }
 0x289   :  { %994 = vmatprep.subr.bf16.mxu0 %v993_v7 }
 0x28c   :  { %996 = vmatpush3.bf16.msra.mxu0 %v995_v14 }
 0x28d   :  { %998 = vmatprep.subr.bf16.mxu0 %v997_v15 }
 0x290   :  { %1000 = vmatpush3.bf16.msra.mxu0 %v999_v20 }
 0x291   :  { %1002 = vmatprep.subr.bf16.mxu0 %v1001_v21 }
 0x294   :  { %1004 = vmatpush3.bf16.msra.mxu0 %v1003_v0 }
 0x297   :  { %601 = vmatmul.mubr.f32.vlgmr.msra.gmra.mrb[4].mxu0 %v1241_v26 }
 0x34a   :  { %v532_v27 = vpop.f32.mrb[2].mxu0 }
 0x34b   :  { %v876_v28 = vpop.f32.mrb[3].mxu0 }
 0x36a   :  { %v734_v29 = vpop.f32.mrb[4].mxu0 }
 0x36b   :  { %v735_v30 = vpop.f32.mrb[5].mxu0 }
 0x36c   :  { %v736_v31 = vadd.f32 %v735_v30, %v734_v29 }
 0x36e   :  { %v603_v33 = vadd.f32 %v736_v31, %v532_v27 }
 0x370   :  { %v613_v34 = vadd.f32 %v633_v32, %v603_v33 }
 0x372   :  { %614 = vst [vmem:[#allocation9] sm:$0xff] %v613_v34 }
 0x373   :  { %1097 = shalt.err (!%p1094_p0)
}
 0x374   :  { %s1098_s14 = scalar_lea.hbm %s1323_s9, 128 }
 0x375   :  { %p1099_p1 = scmp.ne.s32.totalorder %s1323_s9, %s1098_s14  ;;  %p1102_p2 = scmp.lt.u32.totalorder %s1098_s14, %s1323_s9 }
 0x377   :  { %p1104_p3 = pnand %p1102_p2, %p1099_p1 }
 0x379   :  { %1107 = shalt.err (!%p1104_p3)
}
 0x37a   :  { %624 = dma.vmem_to_hbm [thread:$0]  %s622_s11, 128, %s1323_s9, [#allocation5]  }
 0x37b   :  { %1112 = dma.done.wait [#allocation5], 128  }
 0x37c   :  { %1113 = vsyncadd [#allocation5], 4294967168 }
 0x37d   :  { %628 = vsyncpa [#allocation4], 1 }
 0x37e   :  { %629 = vsyncpa [#allocation7], 1 }
 0x37f   :  { %630 = vsyncpa [#allocation5], 1 }

</bundles_post_ra>
